<compile_context>
chip_gen: v6e
topology: v6e:2x2x1
jax: 0.10.0
libtpu: 0.0.40
codegen_flags: <defaults>
</compile_context>

<pallas_src>
import functools
import math

import jax
import jax.numpy as jnp
from jax import lax
from jax.experimental import pallas as pl
from jax.experimental.pallas import tpu as pltpu

_MIB = 1024 * 1024


# ----------------------------------------------------------------------------
# Hardware queries (trace time, safe fallbacks).
# ----------------------------------------------------------------------------
def _vmem_capacity_bytes():
    """Physical VMEM per core; conservative 64 MiB (v7x-sized) fallback."""
    try:
        return int(pltpu.get_tpu_info().vmem_capacity_bytes)
    except Exception:
        return 64 * _MIB


def _device_kind():
    try:
        return jax.devices()[0].device_kind.lower()
    except Exception:
        return ""


def _has_bf16_eup():
    """v6e / v7x have a bf16 EUP/VPU path; v5e (and older) do not."""
    kind = _device_kind()
    return not any(tag in kind for tag in ("v2", "v3", "v4", "v5"))


def _dtype_plan(in_dtype, fast_math):
    """Decide matmul (MXU) and exp (EUP) dtypes.

    fast_math=None -> auto: on for bf16 inputs (no extra precision loss), off
    for f32 inputs (keeps tight parity with the PyTorch module by default).
    """
    in_dtype = jnp.dtype(in_dtype)
    if fast_math is None:
        fast_math = in_dtype == jnp.dtype(jnp.bfloat16)
    if fast_math:
        compute_dtype = jnp.dtype(jnp.bfloat16)
        exp_dtype = jnp.dtype(jnp.bfloat16) if _has_bf16_eup() else jnp.dtype(jnp.float32)
    else:
        compute_dtype = in_dtype
        exp_dtype = jnp.dtype(jnp.float32)
    return fast_math, compute_dtype, exp_dtype


# ----------------------------------------------------------------------------
# Kernels.
# ----------------------------------------------------------------------------
def _attn_kernel(q_ref, k_ref, v_ref, o_ref, *, scale2, compute_dtype,
                 exp_dtype, approx_recip):
    """Single-shot softmax: one grid step = Hb heads x one query tile.

    q_ref: [Hb, C, Tq], k_ref/v_ref: [Hb, C, T], o_ref: [Hb, C, Tq].
      scores[h,t,s] = sum_c (q[h,c,t]*scale^2) * k[h,c,s]
      out[h,c,t]    = softmax_s(scores)[h,t,s] @ v[h,c,s]
    matching th.einsum('bct,bcs->bts') + softmax(f32) + th.einsum('bts,bcs->bct').
    """
    q = q_ref[...]
    k = k_ref[...]
    v = v_ref[...]

    # Fold the two `scale` multiplies into a single operand scaling of q.
    qs = (q * jnp.asarray(scale2, q.dtype)).astype(compute_dtype)

    # scores[h, t, s] = sum_c qs[h, c, t] * k[h, c, s]   (transpose-free)
    scores = lax.dot_general(
        qs, k.astype(compute_dtype),
        dimension_numbers=(((1,), (1,)), ((0,), (0,))),
        preferred_element_type=jnp.float32)              # (Hb, Tq, T) f32

    # Softmax statistics; exp may run in bf16 on v6e/v7x, m/l stay f32.
    m = jnp.max(scores, axis=-1, keepdims=True)
    e = jnp.exp((scores - m).astype(exp_dtype))          # (Hb, Tq, T)
    l = jnp.sum(e.astype(jnp.float32), axis=-1)          # (Hb, Tq) f32

    # Unnormalized PV matmul, f32 MXU accumulation.
    out = lax.dot_general(
        v.astype(compute_dtype), e.astype(compute_dtype),
        dimension_numbers=(((2,), (2,)), ((0,), (0,))),
        preferred_element_type=jnp.float32)              # (Hb, C, Tq) f32

    # Normalize the small (Hb, C, Tq) output on the EUP, not the weights.
    inv_l = pl.reciprocal(l, approx=approx_recip)
    o_ref[...] = (out * inv_l[:, None, :]).astype(o_ref.dtype)


def _attn_flash_kernel(q_ref, k_ref, v_ref, o_ref, m_sc, l_sc, acc_sc, *,
                       scale2, compute_dtype, exp_dtype, approx_recip):
    """Online-softmax (flash) path: inner key-tile grid axis with VMEM state.

    q_ref: [Hb, C, Tq], k_ref/v_ref: [Hb, C, Tk], o_ref: [Hb, C, Tq].
    m_sc/l_sc: [Hb, Tq, 1] f32, acc_sc: [Hb, C, Tq] f32.
    """
    s_idx = pl.program_id(2)
    hb, ch, tq = acc_sc.shape

    @pl.when(s_idx == 0)
    def _():
        m_sc[...] = jnp.full(m_sc.shape, -jnp.inf, dtype=m_sc.dtype)
        l_sc[...] = jnp.zeros_like(l_sc)
        acc_sc[...] = jnp.zeros_like(acc_sc)

    q = q_ref[...]
    qs = (q * jnp.asarray(scale2, q.dtype)).astype(compute_dtype)
    k = k_ref[...].astype(compute_dtype)
    v = v_ref[...].astype(compute_dtype)

    scores = lax.dot_general(
        qs, k,
        dimension_numbers=(((1,), (1,)), ((0,), (0,))),
        preferred_element_type=jnp.float32)              # (Hb, Tq, Tk) f32

    m_prev = m_sc[...]
    m_new = jnp.maximum(m_prev, jnp.max(scores, axis=-1, keepdims=True))
    alpha = jnp.exp(m_prev - m_new)                      # (Hb, Tq, 1) f32
    e = jnp.exp((scores - m_new).astype(exp_dtype))      # (Hb, Tq, Tk)

    # Running denominator stays f32 (bf16 e is upcast before accumulation).
    l_sc[...] = alpha * l_sc[...] + jnp.sum(
        e.astype(jnp.float32), axis=-1, keepdims=True)

    pv = lax.dot_general(
        v, e.astype(compute_dtype),
        dimension_numbers=(((2,), (2,)), ((0,), (0,))),
        preferred_element_type=jnp.float32)              # (Hb, C, Tq) f32

    # alpha lives with Tq in the sublane dim; reshape to (Hb, 1, Tq) so it
    # broadcasts over channels of the lane-major accumulator.
    acc_sc[...] = jnp.reshape(alpha, (hb, 1, tq)) * acc_sc[...] + pv
    m_sc[...] = m_new

    @pl.when(s_idx == pl.num_programs(2) - 1)
    def _():
        inv_l = pl.reciprocal(l_sc[...], approx=approx_recip)   # (Hb, Tq, 1)
        o_ref[...] = (acc_sc[...] * jnp.reshape(inv_l, (hb, 1, tq))
                      ).astype(o_ref.dtype)


# ----------------------------------------------------------------------------
# Tile selection (VMEM-budget driven).
# ----------------------------------------------------------------------------
def _divisors_desc(n, cap):
    cap = max(1, min(n, cap))
    return [d for d in range(cap, 0, -1) if n % d == 0]


def _tq_candidates(T):
    if T % 128 != 0 or T <= 128:
        return [T]
    return [T] + [c for c in (2048, 1024, 512, 384, 256, 128)
                  if c < T and T % c == 0]


def _working_set_single(hb, tq, *, ch, T, in_bytes, cmp_bytes, exp_bytes):
    io = 2 * hb * ch * (2 * tq + 2 * T) * in_bytes        # double-buffered q,k,v,o
    scores = hb * tq * T * 4                               # f32 scores
    e = hb * tq * T * exp_bytes                            # exp output
    sum_up = hb * tq * T * 4 if exp_bytes < 4 else 0       # f32 upcast for row sum
    p = hb * tq * T * cmp_bytes if cmp_bytes != exp_bytes else 0
    acc = hb * ch * tq * 4                                 # f32 PV result pre-cast
    return io + scores + e + sum_up + p + acc


def _working_set_flash(hb, tq, tk, *, ch, in_bytes, cmp_bytes, exp_bytes):
    io = 2 * hb * ch * (2 * tq + 2 * tk) * in_bytes
    scores = hb * tq * tk * 4
    e = hb * tq * tk * exp_bytes
    sum_up = hb * tq * tk * 4 if exp_bytes < 4 else 0
    p = hb * tq * tk * cmp_bytes if cmp_bytes != exp_bytes else 0
    state = 2 * hb * ch * tq * 4 + 2 * hb * tq * 4         # acc scratch + pv + m/l
    return io + scores + e + sum_up + p + state


def _choose_single_tiles(B, ch, T, budget, in_bytes, cmp_bytes, exp_bytes):
    # Cap hb at B//2 so the (parallel) heads axis has >= 2 grid steps and both
    # v7x TensorCores get work (free on single-TC v5e/v6e).
    hb_cands = _divisors_desc(B, B // 2 if B >= 2 else 1)
    best = None
    for tq in _tq_candidates(T):
        for hb in hb_cands:
            if _working_set_single(hb, tq, ch=ch, T=T, in_bytes=in_bytes,
                                   cmp_bytes=cmp_bytes,
                                   exp_bytes=exp_bytes) <= budget:
                if best is None or hb * tq > best[0]:
                    best = (hb * tq, hb, tq)
                break
    return None if best is None else (best[1], best[2])


def _choose_flash_tiles(B, ch, T, budget, in_bytes, cmp_bytes, exp_bytes, key_tile):
    if key_tile is not None:
        assert T % key_tile == 0, "key_tile must divide the sequence length"
        tk_cands = [key_tile]
    else:
        tk_cands = [c for c in (512, 256, 128) if T % c == 0] or [T]
    hb_cands = _divisors_desc(B, B // 2 if B >= 2 else 1)
    for tk in tk_cands:
        best = None
        for tq in _tq_candidates(T):
            for hb in hb_cands:
                if _working_set_flash(hb, tq, tk, ch=ch, in_bytes=in_bytes,
                                      cmp_bytes=cmp_bytes,
                                      exp_bytes=exp_bytes) <= budget:
                    if best is None or hb * tq > best[0]:
                        best = (hb * tq, hb, tq)
                    break
        if best is not None:
            return best[1], best[2], tk
    return 1, _tq_candidates(T)[-1], tk_cands[-1]


# ----------------------------------------------------------------------------
# Public entry point.
# ----------------------------------------------------------------------------
def qkv_attention(qkv, n_heads, *, fast_math=None, key_tile=None,
                  flash_min_seq=2048):
    """Pallas implementation of QKVAttention.forward.

    :param qkv: [N, 3*H*C, T] array.
    :return:    [N, H*C, T] array.
    """
    N, width, T = qkv.shape
    assert width % (3 * n_heads) == 0
    ch = width // (3 * n_heads)
    B = N * n_heads
    scale = 1.0 / math.sqrt(math.sqrt(ch))
    scale2 = scale * scale                      # folded into q inside the kernel

    fast_math, compute_dtype, exp_dtype = _dtype_plan(qkv.dtype, fast_math)
    in_bytes = jnp.dtype(qkv.dtype).itemsize
    cmp_bytes = compute_dtype.itemsize
    exp_bytes = exp_dtype.itemsize

    # Generation-aware VMEM budget: ~3/4 of physical capacity (96 MiB on
    # v5e/v6e, 48 MiB on v7x), with ~15% headroom for Mosaic internal scratch.
    vmem_cap = _vmem_capacity_bytes()
    vmem_limit = max(16 * _MIB, min(vmem_cap * 3 // 4, 100 * _MIB))
    tile_budget = int(vmem_limit * 0.85)

    # Glue: split into q, k, v and fold heads into the batch dim.
    q, k, v = jnp.split(qkv, 3, axis=1)         # each [N, H*C, T]
    q = q.reshape(B, ch, T)
    k = k.reshape(B, ch, T)
    v = v.reshape(B, ch, T)

    flash_ok = (T % 128 == 0) and T > 128
    single = _choose_single_tiles(B, ch, T, tile_budget,
                                  in_bytes, cmp_bytes, exp_bytes)
    use_flash = flash_ok and (key_tile is not None or T >= flash_min_seq
                              or single is None)

    cost_estimate = pl.CostEstimate(
        flops=4 * B * ch * T * T,
        transcendentals=B * T * T,
        bytes_accessed=4 * B * ch * T * in_bytes)

    def _params(sem):
        return pltpu.CompilerParams(dimension_semantics=sem,
                                    vmem_limit_bytes=int(vmem_limit))

    if use_flash:
        hb, tq, tk = _choose_flash_tiles(B, ch, T, tile_budget, in_bytes,
                                         cmp_bytes, exp_bytes, key_tile)
        kernel = functools.partial(
            _attn_flash_kernel, scale2=scale2, compute_dtype=compute_dtype,
            exp_dtype=exp_dtype, approx_recip=fast_math)
        out = pl.pallas_call(
            kernel,
            out_shape=jax.ShapeDtypeStruct((B, ch, T), qkv.dtype),
            grid_spec=pltpu.PrefetchScalarGridSpec(
                num_scalar_prefetch=0,
                grid=(B // hb, T // tq, T // tk),     # key tiles innermost
                in_specs=[
                    pl.BlockSpec((hb, ch, tq), lambda b, t, s: (b, 0, t)),
                    pl.BlockSpec((hb, ch, tk), lambda b, t, s: (b, 0, s)),
                    pl.BlockSpec((hb, ch, tk), lambda b, t, s: (b, 0, s)),
                ],
                out_specs=pl.BlockSpec((hb, ch, tq), lambda b, t, s: (b, 0, t)),
                scratch_shapes=[
                    pltpu.VMEM((hb, tq, 1), jnp.float32),   # running max
                    pltpu.VMEM((hb, tq, 1), jnp.float32),   # running denom
                    pltpu.VMEM((hb, ch, tq), jnp.float32),  # output accumulator
                ]),
            compiler_params=_params(("parallel", "arbitrary", "arbitrary")),
            cost_estimate=cost_estimate,
        )(q, k, v)
    else:
        if single is None:
            # TODO(synk): pad T to a multiple of 128 and mask the padded keys so
            # long ragged sequences can use the flash path instead of one tile.
            hb, tq = 1, T
        else:
            hb, tq = single
        kernel = functools.partial(
            _attn_kernel, scale2=scale2, compute_dtype=compute_dtype,
            exp_dtype=exp_dtype, approx_recip=fast_math)
        out = pl.pallas_call(
            kernel,
            out_shape=jax.ShapeDtypeStruct((B, ch, T), qkv.dtype),
            grid_spec=pltpu.PrefetchScalarGridSpec(
                num_scalar_prefetch=0,
                grid=(B // hb, T // tq),              # q-tile innermost: K/V resident
                in_specs=[
                    pl.BlockSpec((hb, ch, tq), lambda b, t: (b, 0, t)),
                    pl.BlockSpec((hb, ch, T), lambda b, t: (b, 0, 0)),
                    pl.BlockSpec((hb, ch, T), lambda b, t: (b, 0, 0)),
                ],
                out_specs=pl.BlockSpec((hb, ch, tq), lambda b, t: (b, 0, t)),
            ),
            compiler_params=_params(("parallel", "arbitrary")),
            cost_estimate=cost_estimate,
        )(q, k, v)

    # Glue: back to PyTorch output convention [N, H*C, T].
    return out.reshape(N, n_heads * ch, T)


def qkv_attention_ref(qkv, n_heads):
    """Pure-JAX reference mirroring the PyTorch forward exactly."""
    N, width, T = qkv.shape
    ch = width // (3 * n_heads)
    q, k, v = jnp.split(qkv, 3, axis=1)
    B = N * n_heads
    q = q.reshape(B, ch, T).astype(jnp.float32)
    k = k.reshape(B, ch, T).astype(jnp.float32)
    v = v.reshape(B, ch, T).astype(jnp.float32)
    scale = 1.0 / math.sqrt(math.sqrt(ch))
    weight = jnp.einsum("bct,bcs->bts", q * scale, k * scale)
    weight = jax.nn.softmax(weight, axis=-1)
    a = jnp.einsum("bts,bcs->bct", weight, v)
    return a.reshape(N, -1, T).astype(qkv.dtype)


if __name__ == "__main__":
    # Small deterministic example consistent with the module's forward:
    # N=2 batch, H=2 heads, C=8 channels/head, T=16 sequence positions
    # -> qkv shape [2, 3*2*8, 16] = [2, 48, 16].
    n_heads = 2
    N, C, T = 2, 8, 16
    key = jax.random.PRNGKey(0)
    qkv = jax.random.normal(key, (N, 3 * n_heads * C, T), dtype=jnp.float32)

    # f32 default path (exact reciprocal, f32 MXU accumulation).
    out = jax.block_until_ready(qkv_attention(qkv, n_heads))
    ref = qkv_attention_ref(qkv, n_heads)
    assert out.shape == (N, n_heads * C, T)
    assert jnp.allclose(out, ref, atol=2e-3, rtol=2e-3), "f32 mismatch vs reference"

    # bf16 (MXU-native, bf16 exp on v6e/v7x) path.
    qkv_bf16 = qkv.astype(jnp.bfloat16)
    out_bf16 = jax.block_until_ready(qkv_attention(qkv_bf16, n_heads))
    ref_bf16 = qkv_attention_ref(qkv_bf16, n_heads)
    assert out_bf16.shape == (N, n_heads * C, T)
    assert jnp.allclose(out_bf16.astype(jnp.float32),
                        ref_bf16.astype(jnp.float32),
                        atol=1e-1, rtol=1e-1), "bf16 mismatch vs reference"

    # Flash (online-softmax) path, forced via key_tile at a modest length.
    T2 = 256
    qkv2 = jax.random.normal(jax.random.PRNGKey(0),
                             (N, 3 * n_heads * C, T2), dtype=jnp.float32)
    out2 = jax.block_until_ready(qkv_attention(qkv2, n_heads, key_tile=128))
    ref2 = qkv_attention_ref(qkv2, n_heads)
    assert out2.shape == (N, n_heads * C, T2)
    assert jnp.allclose(out2, ref2, atol=2e-3, rtol=2e-3), "flash f32 mismatch"

    out2_bf16 = jax.block_until_ready(
        qkv_attention(qkv2.astype(jnp.bfloat16), n_heads, key_tile=128))
    ref2_bf16 = qkv_attention_ref(qkv2.astype(jnp.bfloat16), n_heads)
    assert jnp.allclose(out2_bf16.astype(jnp.float32),
                        ref2_bf16.astype(jnp.float32),
                        atol=1e-1, rtol=1e-1), "flash bf16 mismatch"

    print("KERNEL_OK")
</pallas_src>

<mosaic_0001>
module attributes {stable_mosaic.version = 11 : i64} {
  func.func @_attn_kernel(%arg0: i32, %arg1: i32, %arg2: memref<2x8x16xf32, #tpu.memory_space<vmem>>, %arg3: memref<2x8x16xf32, #tpu.memory_space<vmem>>, %arg4: memref<2x8x16xf32, #tpu.memory_space<vmem>>, %arg5: memref<2x8x16xf32, #tpu.memory_space<vmem>>) attributes {dimension_semantics = [#tpu.dimension_semantics<parallel>, #tpu.dimension_semantics<arbitrary>], iteration_bounds = array<i64: 2, 1>, scalar_prefetch = 0 : i64, scratch_operands = 0 : i64, tpu.core_type = #tpu.core_type<tc>, window_params = [{transform_indices = @transform_0, window_bounds = array<i64: 2, 8, 16>}, {transform_indices = @transform_1, window_bounds = array<i64: 2, 8, 16>}, {transform_indices = @transform_2, window_bounds = array<i64: 2, 8, 16>}, {transform_indices = @transform_3, window_bounds = array<i64: 2, 8, 16>}]} {
    %c0 = arith.constant 0 : index
    %c0_0 = arith.constant 0 : index
    %c0_1 = arith.constant 0 : index
    %0 = vector.load %arg2[%c0, %c0_0, %c0_1] : memref<2x8x16xf32, #tpu.memory_space<vmem>>, vector<2x8x16xf32>
    %c0_2 = arith.constant 0 : index
    %c0_3 = arith.constant 0 : index
    %c0_4 = arith.constant 0 : index
    %1 = vector.load %arg3[%c0_2, %c0_3, %c0_4] : memref<2x8x16xf32, #tpu.memory_space<vmem>>, vector<2x8x16xf32>
    %c0_5 = arith.constant 0 : index
    %c0_6 = arith.constant 0 : index
    %c0_7 = arith.constant 0 : index
    %2 = vector.load %arg4[%c0_5, %c0_6, %c0_7] : memref<2x8x16xf32, #tpu.memory_space<vmem>>, vector<2x8x16xf32>
    %cst = arith.constant 0.353553385 : f32
    %3 = vector.broadcast %cst : f32 to vector<2x8x16xf32>
    %4 = arith.mulf %0, %3 : vector<2x8x16xf32>
    %cst_8 = arith.constant dense<0.000000e+00> : vector<2x16x16xf32>
    %5 = tpu.matmul %4, %1, %cst_8 {dimension_numbers = #tpu.dot_dimension_numbers<[1], [1], [2], [2], [0, 0, 0, 2, 1, 2], [0], [0]>} : vector<2x8x16xf32>, vector<2x8x16xf32>, vector<2x16x16xf32> -> vector<2x16x16xf32>
    %cst_9 = arith.constant dense<0xFF800000> : vector<2x16xf32>
    %6 = vector.multi_reduction <maximumf>, %5, %cst_9 [2] : vector<2x16x16xf32> to vector<2x16xf32>
    %7 = vector.shape_cast %6 : vector<2x16xf32> to vector<2x16x1xf32>
    %8 = vector.broadcast %7 : vector<2x16x1xf32> to vector<2x16x16xf32>
    %9 = arith.subf %5, %8 : vector<2x16x16xf32>
    %10 = math.exp %9 : vector<2x16x16xf32>
    %cst_10 = arith.constant dense<0.000000e+00> : vector<2x16xf32>
    %11 = vector.multi_reduction <add>, %10, %cst_10 [2] : vector<2x16x16xf32> to vector<2x16xf32>
    %cst_11 = arith.constant dense<0.000000e+00> : vector<2x8x16xf32>
    %12 = tpu.matmul %2, %10, %cst_11 {dimension_numbers = #tpu.dot_dimension_numbers<[2], [2], [1], [1], [0, 0, 0, 1, 1, 1], [0], [0]>} : vector<2x8x16xf32>, vector<2x16x16xf32>, vector<2x8x16xf32> -> vector<2x8x16xf32>
    %13 = tpu.reciprocal %11 : vector<2x16xf32> -> vector<2x16xf32>
    %14 = vector.shape_cast %13 : vector<2x16xf32> to vector<2x1x16xf32>
    %15 = vector.broadcast %14 : vector<2x1x16xf32> to vector<2x8x16xf32>
    %16 = arith.mulf %12, %15 : vector<2x8x16xf32>
    %c0_12 = arith.constant 0 : index
    %c0_13 = arith.constant 0 : index
    %c0_14 = arith.constant 0 : index
    %17 = vector.load %arg5[%c0_12, %c0_13, %c0_14] : memref<2x8x16xf32, #tpu.memory_space<vmem>>, vector<2x8x16xf32>
    tpu.vector_store %arg5[%c0_12, %c0_13, %c0_14], %16 {strides = array<i32>} : memref<2x8x16xf32, #tpu.memory_space<vmem>>, vector<2x8x16xf32>,
    return
  }
  func.func @transform_0(%arg0: i32, %arg1: i32) -> (i32, i32, i32) {
    %c0_i32 = arith.constant 0 : i32
    %c0_i32_0 = arith.constant 0 : i32
    return %arg0, %c0_i32, %arg1 : i32, i32, i32
  }
  func.func @transform_1(%arg0: i32, %arg1: i32) -> (i32, i32, i32) {
    %c0_i32 = arith.constant 0 : i32
    %c0_i32_0 = arith.constant 0 : i32
    %c0_i32_1 = arith.constant 0 : i32
    return %arg0, %c0_i32, %c0_i32_0 : i32, i32, i32
  }
  func.func @transform_2(%arg0: i32, %arg1: i32) -> (i32, i32, i32) {
    %c0_i32 = arith.constant 0 : i32
    %c0_i32_0 = arith.constant 0 : i32
    %c0_i32_1 = arith.constant 0 : i32
    return %arg0, %c0_i32, %c0_i32_0 : i32, i32, i32
  }
  func.func @transform_3(%arg0: i32, %arg1: i32) -> (i32, i32, i32) {
    %c0_i32 = arith.constant 0 : i32
    %c0_i32_0 = arith.constant 0 : i32
    return %arg0, %c0_i32, %arg1 : i32, i32, i32
  }
}

</mosaic_0001>

<bundles_post_ra>
// kernel: tpu_custom_call.1
= control target key start
LH: loop header
LB: loop body
LE: loop exit
PB: predicated region body
PF: predicated region fallthrough
CT: control target
= control target key end

     0   :  { %s1518_s0 = inlined_call_operand.hbm [shape: f32[4,8,16], index: 0, kind: input, shape index: {}]   ;;  %s1519_s1 = inlined_call_operand.hbm [shape: f32[4,8,16], index: 1, kind: input, shape index: {}]   ;;  %s1520_s2 = inlined_call_operand.hbm [shape: f32[4,8,16], index: 2, kind: input, shape index: {}]   ;;  %s1521_s3 = inlined_call_operand.hbm [shape: f32[4,8,16], index: 3, kind: output, shape index: {}]  }
   0x1   :  { %1527 = sst [smem:[#allocation15_spill]] %s1519_s1 }
   0x2   :  { %8 = vsyncpa [#allocation3], 0 }
   0x3   :  { %10 = vsyncpa [#allocation3 + $0x1], 0 }
   0x4   :  { %11 = vsyncpa [#allocation6], 0 }
   0x5   :  { %13 = vsyncpa [#allocation6 + $0x1], 0 }
   0x6   :  { %14 = vsyncpa [#allocation4], 0 }
   0x7   :  { %16 = vsyncpa [#allocation4 + $0x1], 0  ;;  %s1281_s12 = smov 0   ;;  %s1283_s13 = smov 0  }
   0x8   :  { %s1285_s14 = smov 0   ;;  %s1287_s15 = smov 0  }
   0x9   :  { %s1289_s16 = smov 0   ;;  %s1291_s17 = smov 0  }
   0xa LB: > { %1528 = sst [smem:[#allocation12_spill]] %s1245_s16  ;;  %s1312_s18 = sadd.s32 4294967295, %s1249_s17   ;;  %s1249_s17 = sphi %s1291_s17, %s22_s17   ;;  %s1245_s16 = sphi %s1289_s16, %s1543_s16   ;;  %s1241_s15 = sphi %s1287_s15, %s1542_s15   ;;  %s1237_s14 = sphi %s1285_s14, %s1546_s14   ;;  %s1233_s13 = sphi %s1283_s13, %s1545_s13   ;;  %s1229_s12 = sphi %s1281_s12, %s1544_s12  }
   0xb   : > { %s915_s19 = sadd.s32 4294967294, %s1249_s17   ;;  %s34_s20 = sadd.s32 1, %s1245_s16 }
   0xc   : > { %s43_s21 = sadd.s32 1, %s1237_s14  ;;  %p36_p0 = scmp.ge.s32.totalorder %s34_s20, 2 }
   0xd   : > { %p50_p1 = scmp.ne.s32.totalorder %s1237_s14, %s1233_s13  ;;  %p51_p2 = scmp.eq.s32.totalorder %s1249_s17, 0 }
   0xe   : > { %p56_p3 = scmp.ne.s32.totalorder %s1233_s13, %s1229_s12  ;;  %s1548_s20 = smov (%p36_p0, %s34_s20), 0 }
   0xf   : > { %1529 = sst [smem:[#allocation13_spill]] %s1548_s20  ;;  %p1324_p4 = por %p51_p2, %p50_p1 }
  0x10   : > { %p57_p5 = scmp.eq.s32.totalorder %s1312_s18, 0  ;;  %s38_s23 = ssub.s32 %s1245_s16, %s1548_s20 }
  0x11   : > { %p134_p6 = scmp.eq.s32.totalorder %s1312_s18, 1  ;;  %p41_p7 = scmp.eq.s32.totalorder %s38_s23, 0 }
  0x12   : > { %p1332_p8 = por %p57_p5, %p56_p3  ;;  %p140_p10 = scmp.eq.s32.totalorder %s915_s19, 1 }
  0x13   : > { %p1336_p9 = por %p134_p6, %p50_p1  ;;  %p1009_p13 = scmp.lt.s32.totalorder %s1249_s17, 2 }
  0x14   : > { %s1341_s26 = scalar_select %p41_p7, %s1237_s14, %s43_s21  }
  0x15   : > { %p1343_p11 = por %p140_p10, %p56_p3  ;;  %s1522_s28 = sand.u32 1, %s1237_s14  }
  0x16   : > { %1533 = sst [smem:[#allocation14_spill]] %s1341_s26  ;;  %s1352_s29 = sshll.u32 %s1522_s28, 4 }
  0x17   : > { %s1355_s30 = sshll.u32 %s1245_s16, 8  ;;  %p1359_p0 = pnand %p1009_p13, %p1324_p4 }
  0x18   : > { %s182_s5 = sand.u32 1, %s1249_s17   ;;  %s1536_s1 = sld [smem:[#allocation15_spill]] }
  0x19   : > { %s186_s9 = scalar_lea.vmem [#allocation5], %s1352_s29  ;;  %p927_p1 = scmp.ge.s32.totalorder %s1249_s17, 1 }
  0x1a   : > { %s193_s10 = sshll.u32 %s186_s9, 4  ;;  %p222_p2 = scmp.lt.s32.totalorder %s1249_s17, 3  ;;  %s194_s10 = int_to_ptr.vmem [resolvable:$true] %s193_s10 }
  0x1b   : > { %s1371_s11 = scalar_lea.sflag [#allocation6], %s182_s5  ;;  %p1083_p3 = pneg %p1359_p0 }
  0x1c   : > { %s1094_s19 = scalar_lea.vmem %s194_s10, 256  ;;  %s1251_s21 = smov [#allocation5]  }
  0x1d   : > { %p1095_p4 = scmp.ne.s32.totalorder %s194_s10, %s1094_s19  ;;  %s1099_s22 = sshll.u32 %s1251_s21, 4  ;;  %s1100_s22 = int_to_ptr.vmem [resolvable:$false] %s1099_s22 }
  0x1e   : > { %s192_s8 = scalar_lea.hbm %s1536_s1, %s1355_s30  ;;  %s1101_s23 = scalar_lea.vmem %s1100_s22, 512 }
  0x1f   : > { %p1097_p5 = pnand %p1095_p4, %p1083_p3  ;;  %p1102_p7 = scmp.lt.s32.totalorder %s194_s10, %s1100_s22 }
  0x20   : > { %p1103_p10 = scmp.lt.s32.totalorder %s1101_s23, %s1094_s19 }
  0x21   : > { %p1098_p6 = pneg %p1097_p5 }
  0x22   : > { %p1104_p13 = por %p1103_p10, %p1102_p7 }
  0x24   : > { %p1105_p12 = pnand %p1104_p13, %p1098_p6 }
  0x26   : > { %1108 = shalt.err (!%p1105_p12)
}
  0x27   : > { %s1525_s6 = smov 128   ;;  %s1253_s5 = smov 8  }
  0x28   : > { %1001 = dma.hbm_to_vmem [thread:$0]  (!%p1359_p0), %s192_s8, 256, %s194_s10, %s1371_s11, %s1525_s6, %s1525_s6, %s1253_s5  }
  0x29   : > { %p1388_p4 = pnand %p927_p1, %p222_p2  ;;  %s171_s21 = scalar_lea.hbm %s1518_s0, %s1355_s30 }
  0x2a   : > { %s164_s22 = scalar_lea.vmem [#allocation2], %s1352_s29  ;;  %s213_s20 = scalar_lea.hbm %s1520_s2, %s1355_s30 }
  0x2b   : > { %s172_s23 = sshll.u32 %s164_s22, 4  ;;  %s1538_s16 = sand.u32 1, %s1237_s14   ;;  %s173_s23 = int_to_ptr.vmem [resolvable:$true] %s172_s23 }
  0x2c   : > { %s161_s26 = scalar_lea.sflag [#allocation3], %s1538_s16  ;;  %s1122_s8 = scalar_lea.vmem %s173_s23, 256 }
  0x2d   : > { %p1123_p12 = scmp.ne.s32.totalorder %s173_s23, %s1122_s8  ;;  %s1254_s10 = smov [#allocation2]  }
  0x2e   : > { %s1127_s6 = sshll.u32 %s1254_s10, 4  ;;  %s1128_s6 = int_to_ptr.vmem [resolvable:$false] %s1127_s6 }
  0x2f   : > { %p1125_p1 = pnand %p1123_p12, %p1083_p3  ;;  %s1129_s9 = scalar_lea.vmem %s1128_s6, 512 }
  0x30   : > { %p1130_p5 = scmp.lt.s32.totalorder %s173_s23, %s1128_s6  ;;  %p1131_p6 = scmp.lt.s32.totalorder %s1129_s9, %s1122_s8 }
  0x31   : > { %p1126_p2 = pneg %p1125_p1 }
  0x32   : > { %p1132_p7 = por %p1131_p6, %p1130_p5 }
  0x34   : > { %p1133_p10 = pnand %p1132_p7, %p1126_p2 }
  0x36   : > { %1136 = shalt.err (!%p1133_p10)
}
  0x37   : > { %s1539_s1 = smov 128   ;;  %s207_s16 = scalar_lea.vmem [#allocation7], %s1352_s29 }
  0x38   : > { %998 = dma.hbm_to_vmem [thread:$0]  (!%p1359_p0), %s171_s21, 256, %s173_s23, %s161_s26, %s1539_s1, %s1539_s1, %s1253_s5  }
  0x39   : > { %s214_s28 = sshll.u32 %s207_s16, 4  ;;  %s1255_s6 = smov [#allocation7]   ;;  %s215_s28 = int_to_ptr.vmem [resolvable:$true] %s214_s28 }
  0x3a   : > { %s1150_s19 = scalar_lea.vmem %s215_s28, 256  ;;  %s1155_s22 = sshll.u32 %s1255_s6, 4  ;;  %s1156_s22 = int_to_ptr.vmem [resolvable:$false] %s1155_s22 }
  0x3b   : > { %p1151_p13 = scmp.ne.s32.totalorder %s215_s28, %s1150_s19  ;;  %s1157_s8 = scalar_lea.vmem %s1156_s22, 512 }
  0x3c   : > { %p1158_p2 = scmp.lt.s32.totalorder %s215_s28, %s1156_s22  ;;  %p1159_p5 = scmp.lt.s32.totalorder %s1157_s8, %s1150_s19 }
  0x3d   : > { %p1153_p12 = pnand %p1151_p13, %p1083_p3 }
  0x3e   : > { %p1160_p6 = por %p1159_p5, %p1158_p2 }
  0x3f   : > { %p1154_p1 = pneg %p1153_p12 }
  0x41   : > { %p1161_p7 = pnand %p1160_p6, %p1154_p1 }
  0x43   : > { %1164 = shalt.err (!%p1161_p7)
}
  0x44   : > { %1004 = dma.hbm_to_vmem [thread:$0]  (!%p1359_p0), %s213_s20, 256, %s215_s28, %s1371_s11, %s1539_s1, %s1539_s1, %s1253_s5  }
  0x45   : > { %226 = sbr.rel (%p1388_p4) target bundleno = 784 (0x310), region = 32  ;;  %s1429_s21 = sand.u32 (!%p1388_p4), 1, %s1233_s13  }
  0x46   : > { %s1432_s4 = sshll.u32 (!%p1388_p4), %s1429_s21, 4  ;;  %s229_s23 = scalar_lea.sflag (!%p1388_p4), [#allocation3], %s1429_s21 }
  0x47   : > { %s232_s10 = scalar_lea.vmem (!%p1388_p4), [#allocation2], %s1432_s4 }
  0x4a   : > { %1216 = dma.done.wait (%p1332_p8), %s229_s23, 256  }
  0x4b   : > { %1218 = vsyncadd (%p1332_p8), %s229_s23, 4294967040  ;;  %s237_s20 = sand.u32 1, %s1312_s18   ;;  %s241_s11 = scalar_lea.vmem [#allocation5], %s1432_s4 }
  0x4c   : > { %s238_s30 = scalar_lea.sflag [#allocation6], %s237_s20 }
  0x4d   : > { %1220 = dma.done.wait (%p1332_p8), %s238_s30, 512  }
  0x4e   : > { %1222 = vsyncadd (%p1332_p8), %s238_s30, 4294966784  ;;  %v287_v0 = vld [vmem:[%s232_s10] sm:$0xff]  ;;  %v288_v3 = vld [vmem:[%s232_s10 + $0x8] sm:$0xff]  ;;  %vm327_vm0 = vcmask 64512   ;;  %vm522_vm1 = vcmask 130048   ;;  %v1256_v18 = vmov 0.0   ;;  %v725_v45 = vlaneseq }
  0x4f   : > { %v289_v1 = vld [vmem:[%s241_s11] sm:$0xff]  ;;  %v293_v2 = vmul.f32 0.35355338, %v287_v0  ;;  %v294_v4 = vmul.f32 0.35355338, %v288_v3  ;;  %v290_v5 = vld [vmem:[%s241_s11 + $0x8] sm:$0xff] }
  0x50   : > { %963 = vmatprep.subr.mxu0 %v289_v1  ;;  %968 = vmatprep.subr.mxu1 %v290_v5  ;;  %vm1257_vm2 = vmmov 0   ;;  %s250_s18 = scalar_lea.vmem [#allocation7], %s1432_s4  ;;  %v726_v46 = vand.u32 127, %v725_v45  ;;  %v728_v47 = vshrl.u32 %v725_v45, 7  ;;  %s282_s24 = scalar_lea.vmem [#allocation8], %s1432_s4  ;;  %vm736_vm3 = vcmask 130112  }
  0x51   : > { %964 = vmatpush3.msra.mxu0 %v289_v1  ;;  %295 = vxpose.xlu0.b32.start.end [1/1] (short) (narrow) %v293_v2, 16  ;;  %v291_v37 = vld [vmem:[%s250_s18] sm:$0xff]  ;;  %v292_v38 = vld [vmem:[%s250_s18 + $0x8] sm:$0xff]  ;;  %s786_s5 = sshll.u32 %s282_s24, 4  ;;  %s950_s7 = sshll.u32 %s1241_s15, 8  ;;  %s1463_s5 = int_to_ptr.vmem [resolvable:$true] %s786_s5 }
  0x52   : > { %969 = vmatpush3.msra.mxu1 %v290_v5  ;;  %973 = vmatprep.subr.mxu0 %v1256_v18  ;;  %v731_v48 = vadd.s32 4294967288, %v726_v46  ;;  %v729_v50 = vsub.s32 %v726_v46, %v728_v47  ;;  %s1468_s16 = scalar_lea.hbm %s1521_s3, %s950_s7  ;;  %s772_s15 = scalar_lea.sflag [#allocation4], %s1429_s21 }
  0x53   : > { %980 = vmatprep.subr.mxu1 %v1256_v18  ;;  %s1165_s28 = scalar_lea.vmem %s1463_s5, 256  ;;  %s1258_s19 = smov [#allocation8]  }
  0x54   : > { %v734_v53 = vsub.s32 %v731_v48, %v728_v47  ;;  %p1166_p8 = scmp.ne.s32.totalorder %s1463_s5, %s1165_s28  ;;  %s1169_s6 = sshll.u32 %s1258_s19, 4  ;;  %s1170_s6 = int_to_ptr.vmem [resolvable:$false] %s1169_s6 }
  0x55   : > { %s1171_s22 = scalar_lea.vmem %s1170_s6, 512  ;;  %p1172_p4 = scmp.lt.s32.totalorder %s1463_s5, %s1170_s6 }
  0x56   : > { %409 = vxpose.xlu0.b32.start.end [1/1] (short) (narrow) %v294_v4, 16  ;;  %p1167_p0 = pnand %p1166_p8, %p1336_p9  ;;  %p1173_p10 = scmp.lt.s32.totalorder %s1171_s22, %s1165_s28 }
  0x58   : > { %p1168_p3 = pneg %p1167_p0  ;;  %p1174_p13 = por %p1173_p10, %p1172_p4 }
  0x5a   : > { %p1175_p12 = pnand %p1174_p13, %p1168_p3 }
  0xcd   : > { %v311_v6 = vpop.trf.xlu0 }
  0xce   : > { %965 = vmatprep.mubr.msk.f32.mxu0 %vm327_vm0, %v311_v6 }
  0xd1   : > { %v312_v7 = vpop.trf.xlu0 }
  0xd2   : > { %966 = vmatmul.mubr.msk.f32.vlgmr.msra.gmra.mxu0 %vm327_vm0, %v312_v7 }
  0xd3   : > { %977 = vmatprep.mubr.msk.f32.mxu0 %vm1257_vm2, %v1256_v18 }
  0xd5   : > { %v425_v8 = vpop.trf.xlu0 }
  0xd6   : > { %970 = vmatprep.mubr.msk.f32.mxu1 %vm327_vm0, %v425_v8 }
  0xd9   : > { %v426_v9 = vpop.trf.xlu0 }
  0xda   : > { %971 = vmatmul.mubr.msk.f32.vlgmr.msra.gmra.mxu1 %vm327_vm0, %v426_v9 }
  0xdb   : > { %984 = vmatprep.mubr.msk.f32.mxu1 %vm1257_vm2, %v1256_v18 }
 0x192   : > { %v967_v10 = vpop.f32.mrf.mxu0 }
 0x193   : > { %v526_v11 = vsel %vm522_vm1, %v967_v10, -inf }
 0x194   : > { %527 = vmax.xlane.f32.xlu1 %v526_v11  ;;  %v400_v14 = vpop.f32.mrf.mxu0 }
 0x195   : > { %v523_v17 = vsel %vm522_vm1, %v400_v14, -inf }
 0x19a   : > { %v972_v12 = vpop.f32.mrf.mxu1 }
 0x19b   : > { %v532_v13 = vsel %vm522_vm1, %v972_v12, -inf }
 0x19c   : > { %533 = vmax.xlane.f32.xlu1 %v532_v13  ;;  %v513_v15 = vpop.f32.mrf.mxu1 }
 0x19d   : > { %v529_v16 = vsel %vm522_vm1, %v513_v15, -inf }
 0x19e   : > { %530 = vmax.xlane.f32.xlu0 %v529_v16 }
 0x1a0   : > { %524 = vmax.xlane.f32.xlu1 %v523_v17 }
 0x21d   : > { %v528_v19 = vpop.xlane.xlu1 %527 }
 0x21e   : > { %v536_v20 = vsub.f32 %v967_v10, %v528_v19 }
 0x220   : > { %v541_v21 = vmul.f32 1.442695, %v536_v20 }
 0x222   : > { %1065 = vpow2.f32 %v541_v21 }
 0x225   : > { %v534_v22 = vpop.xlane.xlu1 %533 }
 0x226   : > { %v538_v23 = vsub.f32 %v972_v12, %v534_v22 }
 0x227   : > { %v531_v24 = vpop.xlane.xlu0 %530 }
 0x228   : > { %v545_v25 = vmul.f32 1.442695, %v538_v23  ;;  %v537_v26 = vsub.f32 %v513_v15, %v531_v24 }
 0x229   : > { %v525_v27 = vpop.xlane.xlu1 %524 }
 0x22a   : > { %1067 = vpow2.f32 %v545_v25  ;;  %v543_v28 = vmul.f32 1.442695, %v537_v26  ;;  %v535_v29 = vsub.f32 %v400_v14, %v525_v27 }
 0x22c   : > { %v539_v30 = vmul.f32 1.442695, %v535_v29  ;;  %1069 = vpow2.f32 %v543_v28 }
 0x22e   : > { %1071 = vpow2.f32 %v539_v30 }
 0x22f   : > { %v1066_v31 = vpop.eup %1065 }
 0x230   : > { %974 = vmatpush3.xpose.msk.msra.mxu0 %vm522_vm1, %v1066_v31  ;;  %v550_v32 = vsel %vm522_vm1, %v1066_v31, 0.0 }
 0x231   : > { %551 = vadd.xlane.f32.xlu1 %v550_v32  ;;  %975 = vmatprep.subr.mxu0 %v1256_v18 }
 0x237   : > { %v1068_v33 = vpop.eup %1067 }
 0x238   : > { %981 = vmatpush3.xpose.msk.msra.mxu1 %vm522_vm1, %v1068_v33  ;;  %v556_v40 = vsel %vm522_vm1, %v1068_v33, 0.0 }
 0x239   : > { %982 = vmatprep.subr.mxu1 %v1256_v18  ;;  %v1070_v34 = vpop.eup %1069 }
 0x23a   : > { %v553_v39 = vsel %vm522_vm1, %v1070_v34, 0.0 }
 0x23b   : > { %v1072_v35 = vpop.eup %1071 }
 0x23c   : > { %976 = vmatpush3.xpose.msk.msra.mxu0 %vm522_vm1, %v1072_v35  ;;  %983 = vmatpush3.xpose.msk.msra.mxu1 %vm522_vm1, %v1070_v34  ;;  %v547_v36 = vsel %vm522_vm1, %v1072_v35, 0.0 }
 0x23d   : > { %548 = vadd.xlane.f32.xlu1 %v547_v36 }
 0x23f   : > { %978 = vmatmul.mubr.msk.f32.vlgmr.msra.gmra.mxu0 %vm522_vm1, %v291_v37  ;;  %985 = vmatmul.mubr.msk.f32.vlgmr.msra.gmra.mxu1 %vm522_vm1, %v292_v38 }
 0x241   : > { %554 = vadd.xlane.f32.xlu1 %v553_v39 }
 0x245   : > { %557 = vadd.xlane.f32.xlu1 %v556_v40 }
 0x2ba   : > { %v552_v41 = vpop.xlane.xlu1 %551 }
 0x2c6   : > { %v549_v42 = vpop.xlane.xlu1 %548 }
 0x2c7   : > { %1073 = vrcp.f32 %v549_v42 }
 0x2ca   : > { %v555_v43 = vpop.xlane.xlu1 %554 }
 0x2ce   : > { %v558_v44 = vpop.xlane.xlu1 %557 }
 0x2cf   : > { %1075 = vrcp.f32 %v558_v44 }
 0x2d0   : > { %1077 = vrcp.f32 %v552_v41 }
 0x2d1   : > { %1079 = vrcp.f32 %v555_v43 }
 0x2d4   : > { %v1074_v49 = vpop.eup %1073 }
 0x2d5   : > { %v730_v55 = vrot.slane %v1074_v49, %v729_v50 }
 0x2dc   : > { %v1076_v51 = vpop.eup %1075 }
 0x2dd   : > { %v1078_v52 = vpop.eup %1077  ;;  %v745_v56 = vrot.slane %v1076_v51, %v734_v53 }
 0x2de   : > { %v1080_v54 = vpop.eup %1079  ;;  %v735_v57 = vrot.slane %v1078_v52, %v734_v53 }
 0x2df   : > { %v741_v58 = vrot.slane %v1080_v54, %v729_v50 }
 0x2e0   : > { %v737_v60 = vsel %vm736_vm3, %v735_v57, %v730_v55 }
 0x2e1   : > { %v746_v62 = vsel %vm736_vm3, %v745_v56, %v741_v58 }
 0x2ff   : > { %v634_v59 = vpop.f32.mrf.mxu0  ;;  %v713_v61 = vpop.f32.mrf.mxu1 }
 0x300   : > { %v767_v63 = vmul.f32 %v737_v60, %v634_v59  ;;  %v768_v0 = vmul.f32 %v746_v62, %v713_v61 }
 0x301   : > { %v979_v1 = vpop.f32.mrf.mxu0  ;;  %v986_v2 = vpop.f32.mrf.mxu1 }
 0x302   : > { %769 = vst.msk [vmem:[%s282_s24] sm:$0xff] %vm522_vm1, %v767_v63  ;;  %770 = vst.msk [vmem:[%s282_s24 + $0x8] sm:$0xff] %vm522_vm1, %v768_v0 }
 0x303   : > { %1178 = shalt.err (!%p1175_p12)
}
 0x304   : > { %s1179_s8 = scalar_lea.hbm %s1468_s16, 256  ;;  %s1183_s4 = scalar_lea.hbm %s1521_s3, 512 }
 0x305   : > { %p1180_p1 = scmp.ne.s32.totalorder %s1468_s16, %s1179_s8  ;;  %p1184_p6 = scmp.lt.s32.totalorder %s1468_s16, %s1521_s3 }
 0x306   : > { %p1185_p7 = scmp.lt.s32.totalorder %s1183_s4, %s1179_s8 }
 0x307   : > { %p1181_p2 = pnand %p1180_p1, %p1336_p9 }
 0x308   : > { %p1186_p8 = por %p1185_p7, %p1184_p6 }
 0x309   : > { %p1182_p5 = pneg %p1181_p2 }
 0x30b   : > { %p1187_p0 = pnand %p1186_p8, %p1182_p5 }
 0x30d   : > { %1190 = shalt.err (!%p1187_p0)
}
 0x30e   : > { %s1259_s20 = smov 128   ;;  %s1260_s30 = smov 8  }
 0x30f   : > { %993 = dma.vmem_to_hbm [thread:$0]  (%p1336_p9), %s1463_s5, 256, %s1468_s16, %s772_s15, %s1259_s20, %s1259_s20, %s1260_s30  }
 0x310 PF: > { %s801_s11 = sand.u32 1, %s1229_s12   ;;  %p1540_p3 = scmp.ge.s32.totalorder %s1249_s17, 2 }
 0x311   : > { %s802_s18 = scalar_lea.sflag [#allocation4], %s801_s11 }
 0x312   : > { %p1006_p4 = pnand %p1540_p3, %p1343_p11 }
 0x314   : > { %p1007_p10 = pneg %p1006_p4 }
 0x316   : > { %1224 = dma.done.wait (%p1007_p10), %s802_s18, 256  }
 0x317   : > { %1226 = vsyncadd (%p1007_p10), %s802_s18, 4294967040  ;;  %s22_s17 = sadd.s32 1, %s1249_s17   ;;  %s1541_s25 = sld [smem:[#allocation14_spill]] }
 0x318   : > { %p19_p13 = scmp.ge.s32.totalorder %s22_s17, 4   ;;  %s1542_s15 = sld [smem:[#allocation12_spill]] }
 0x319   : > { %s1543_s16 = sld [smem:[#allocation13_spill]]  ;;  %s1544_s12 = smov %s1233_s13 }
 0x31a   : > { %s1545_s13 = smov %s1237_s14  ;;  %21 = sbr.rel (!%p19_p13) target bundleno = 10 (0xa), region = 101 }
 0x31d   : > { %s1546_s14 = smov %s1541_s25 }
 0x31f   :  { %807 = vsyncpa [#allocation3], 1 }
 0x320   :  { %809 = vsyncpa [#allocation3 + $0x1], 1 }
 0x321   :  { %810 = vsyncpa [#allocation6], 1 }
 0x322   :  { %812 = vsyncpa [#allocation6 + $0x1], 1 }
 0x323   :  { %813 = vsyncpa [#allocation4], 1 }
 0x324   :  { %815 = vsyncpa [#allocation4 + $0x1], 1 }

</bundles_post_ra>
